<compile_context>
chip_gen: v5e
topology: v5e:2x2
jax: 0.10.0
libtpu: 0.0.40
codegen_flags: <defaults>
</compile_context>

<pallas_src>
import functools

import jax
import jax.numpy as jnp
import numpy as np
from jax.experimental import pallas as pl
from jax.experimental.pallas import tpu as pltpu


# ----------------------------------------------------------------------------
# Pallas kernel: one timestep per grid iteration; hidden state resident in the
# (revisited) output block across the whole grid.
# ----------------------------------------------------------------------------
def _kinetics_one_pixel_kernel(
    x_ref,      # (1, D, B)   input at timestep t (channel-major: x^T)
    hs0_ref,    # (4, C0, B)  initial hidden state (read only at t == 0)
    pp_ref,     # (8, C0, 1)  packed per-channel params (see _PP_* below)
    bw_ref,     # (C0, D)     bipolar_weight
    aw_ref,     # (C1, C0)    amacrine_weight
    gw_ref,     # (U,  C1)    ganglion linear weight (bias=False)
    ab_ref,     # (C1, 1)     amacrine_bias
    fx_ref,     # (1, U, B)   output at timestep t
    hs_ref,     # (4, C0, B)  hidden state (resident across the grid)
    *,
    dt,
):
    t = pl.program_id(0)

    # Load the initial state into the resident output buffer once.
    @pl.when(t == 0)
    def _():
        hs_ref[...] = hs0_ref[...]

    x = x_ref[0]                                                      # (D, B)

    # --- bipolar: (W * x[:,None]).sum(-1) + b  ==  W @ x^T + b   -> (C0, B)
    fx = jnp.dot(bw_ref[...], x, preferred_element_type=jnp.float32)
    fx = fx + pp_ref[0]                                               # bipolar_bias
    fx = 1.0 / (1.0 + jnp.exp(-fx))                                   # sigmoid

    # --- kinetics: 4-state forward-Euler update (rates per channel)
    ka, kfi, kfr = pp_ref[1], pp_ref[2], pp_ref[3]                    # (C0, 1)
    ksi, ksr = pp_ref[4], pp_ref[5]
    kw, kb = pp_ref[6], pp_ref[7]

    R, A, I1, I2 = hs_ref[0], hs_ref[1], hs_ref[2], hs_ref[3]         # (C0, B)

    ka_u = ka * fx                                                    # stimulus-driven activation
    new_R = R + dt * (kfr * I1 - ka_u * R)
    new_A = A + dt * (ka_u * R - kfi * A)
    new_I1 = I1 + dt * (kfi * A + ksr * I2 - (kfr + ksi) * I1)
    new_I2 = I2 + dt * (ksi * I1 - ksr * I2)

    hs_ref[0] = new_R
    hs_ref[1] = new_A
    hs_ref[2] = new_I1
    hs_ref[3] = new_I2

    # --- scale/shift (scale_shift_chan=True) + spiking ReLU
    fx = jnp.maximum(kw * new_A + kb, 0.0)                            # (C0, B)

    # --- amacrine: W @ fx + b, ReLU                                  -> (C1, B)
    fx = jnp.dot(aw_ref[...], fx, preferred_element_type=jnp.float32) + ab_ref[...]
    fx = jnp.maximum(fx, 0.0)

    # --- ganglion: Linear (bias=False) + numerically-stable Softplus -> (U, B)
    g = jnp.dot(gw_ref[...], fx, preferred_element_type=jnp.float32)
    fx_ref[0] = jnp.maximum(g, 0.0) + jnp.log1p(jnp.exp(-jnp.abs(g)))


# ----------------------------------------------------------------------------
# One-time parameter preprocessing (hoisted out of the step path).
# ----------------------------------------------------------------------------
def prepare_params(params):
    f32 = jnp.float32
    C0 = params["bipolar_weight"].shape[0]
    C1 = params["amacrine_weight"].shape[0]
    # Packed per-channel rows: [bipolar_bias, ka, kfi, kfr, ksi, ksr, kw, kb]
    pp = jnp.stack(
        [
            params["bipolar_bias"].reshape(C0),
            params["ka"].reshape(C0),
            params["kfi"].reshape(C0),
            params["kfr"].reshape(C0),
            params["ksi"].reshape(C0),
            params["ksr"].reshape(C0),
            params["kinetics_w"].reshape(C0),
            params["kinetics_b"].reshape(C0),
        ],
        axis=0,
    ).astype(f32)[..., None]                                          # (8, C0, 1)
    return {
        "pp": pp,
        "bw": params["bipolar_weight"].astype(f32),                   # (C0, D)
        "aw": params["amacrine_weight"].astype(f32),                  # (C1, C0)
        "gw": params["ganglion_weight"].astype(f32),                  # (U,  C1)
        "ab": params["amacrine_bias"].reshape(C1, 1).astype(f32),     # (C1, 1)
    }


# ----------------------------------------------------------------------------
# Wrapper.  x may be (B, D)  -> single step (module semantics), or
#                  (T, B, D) -> T fused recurrent steps in one pallas_call.
# ----------------------------------------------------------------------------
@functools.partial(jax.jit, static_argnames=("dt",))
def kinetics_one_pixel_forward(x, hs, prep, dt=0.01):
    f32 = jnp.float32
    single = x.ndim == 2
    if single:
        x = x[None]                                                   # (1, B, D)
    T, B, D = x.shape
    C0 = prep["bw"].shape[0]
    C1 = prep["aw"].shape[0]
    U = prep["gw"].shape[0]

    x_k = jnp.transpose(x, (0, 2, 1)).astype(f32)                     # (T, D, B)
    hs_k = jnp.transpose(hs[..., 0], (1, 2, 0)).astype(f32)           # (4, C0, B)

    resident3 = lambda t: (0, 0, 0)
    resident2 = lambda t: (0, 0)

    fx_k, hs_new_k = pl.pallas_call(
        functools.partial(_kinetics_one_pixel_kernel, dt=dt),
        grid=(T,),
        in_specs=[
            pl.BlockSpec((1, D, B), lambda t: (t, 0, 0)),             # x (streamed)
            pl.BlockSpec((4, C0, B), resident3),                      # hs0
            pl.BlockSpec((8, C0, 1), resident3),                      # packed params
            pl.BlockSpec((C0, D), resident2),                         # bipolar W
            pl.BlockSpec((C1, C0), resident2),                        # amacrine W
            pl.BlockSpec((U, C1), resident2),                         # ganglion W
            pl.BlockSpec((C1, 1), resident2),                         # amacrine b
        ],
        out_specs=(
            pl.BlockSpec((1, U, B), lambda t: (t, 0, 0)),             # fx per step
            pl.BlockSpec((4, C0, B), resident3),                      # hs (resident)
        ),
        out_shape=(
            jax.ShapeDtypeStruct((T, U, B), f32),
            jax.ShapeDtypeStruct((4, C0, B), f32),
        ),
        input_output_aliases={1: 1},                                  # hs in-place
        compiler_params=pltpu.CompilerParams(
            dimension_semantics=("arbitrary",)),                      # recurrence
    )(x_k, hs_k, prep["pp"], prep["bw"], prep["aw"], prep["gw"], prep["ab"])

    fx = jnp.transpose(fx_k, (0, 2, 1))                               # (T, B, U)
    hs_new = jnp.transpose(hs_new_k, (2, 0, 1))[..., None]            # (B, 4, C0, 1)
    if single:
        fx = fx[0]
    return fx, hs_new


# ----------------------------------------------------------------------------
# Pure-JAX reference (mirrors the PyTorch forward) for correctness checks.
# ----------------------------------------------------------------------------
def reference_forward(x, hs, p, dt=0.01):
    fx = jnp.sum(p["bipolar_weight"][None] * x[:, None], axis=-1) + p["bipolar_bias"]
    fx = jax.nn.sigmoid(fx)[:, :, None]                               # (B, C0, 1)

    R, A, I1, I2 = hs[:, 0], hs[:, 1], hs[:, 2], hs[:, 3]             # (B, C0, 1)
    ka, kfi, kfr = p["ka"][None], p["kfi"][None], p["kfr"][None]
    ksi, ksr = p["ksi"][None], p["ksr"][None]
    ka_u = ka * fx
    new_R = R + dt * (kfr * I1 - ka_u * R)
    new_A = A + dt * (ka_u * R - kfi * A)
    new_I1 = I1 + dt * (kfi * A + ksr * I2 - (kfr + ksi) * I1)
    new_I2 = I2 + dt * (ksi * I1 - ksr * I2)
    hs_new = jnp.stack([new_R, new_A, new_I1, new_I2], axis=1)

    fx = p["kinetics_w"][None] * new_A + p["kinetics_b"][None]
    fx = jnp.maximum(fx, 0.0)[..., 0]                                 # (B, C0)
    fx = jnp.sum(p["amacrine_weight"][None] * fx[:, None], axis=-1) + p["amacrine_bias"]
    fx = jnp.maximum(fx, 0.0)
    fx = jax.nn.softplus(fx @ p["ganglion_weight"].T)
    return fx, hs_new


# ----------------------------------------------------------------------------
# Deterministic parameter init (shapes as in KineticsOnePixel.__init__ with
# defaults: chans=[8,8], n_units=5, img_shape=(40,), k_chan=True,
# scale_shift_chan=True, linear_bias=False).
# ----------------------------------------------------------------------------
def init_params(key, D=40, C0=8, C1=8, n_units=5):
    ks = jax.random.split(key, 7)
    u = lambda k, shp: jax.random.uniform(k, shp, jnp.float32)        # torch.rand analogue
    return {
        "bipolar_weight": u(ks[0], (C0, D)),
        "bipolar_bias": u(ks[1], (C0,)),
        "kinetics_w": u(ks[2], (C0, 1)),
        "kinetics_b": u(ks[3], (C0, 1)),
        "amacrine_weight": u(ks[4], (C1, C0)),
        "amacrine_bias": u(ks[5], (C1,)),
        # nn.Linear default init: U(-1/sqrt(in), 1/sqrt(in))
        "ganglion_weight": jax.random.uniform(
            ks[6], (n_units, C1), jnp.float32,
            minval=-1.0 / np.sqrt(C1), maxval=1.0 / np.sqrt(C1)),
        # Kinetics rate constants (per-channel, k_chan=True), deterministic:
        "ka": jnp.full((C0, 1), 23.0, jnp.float32),
        "kfi": jnp.full((C0, 1), 50.0, jnp.float32),
        "kfr": jnp.full((C0, 1), 87.0, jnp.float32),
        "ksi": jnp.full((C0, 1), 1.46, jnp.float32),
        "ksr": jnp.full((C0, 1), 0.066, jnp.float32),
    }


if __name__ == "__main__":
    B, D, C0, C1, U, T = 4, 40, 8, 8, 5, 8
    DT = 0.01

    key = jax.random.PRNGKey(0)
    k_x, k_hs, k_p = jax.random.split(key, 3)

    x_seq = jax.random.uniform(k_x, (T, B, D), jnp.float32)
    hs = jax.random.uniform(k_hs, (B, 4, C0, 1), jnp.float32)         # (B, S=4, C0, 1)
    params = init_params(k_p, D=D, C0=C0, C1=C1, n_units=U)
    prep = prepare_params(params)                                     # hoisted, done once

    # --- single-step (exact module semantics: forward(x, hs)) ---------------
    fx1, hs1 = kinetics_one_pixel_forward(x_seq[0], hs, prep, dt=DT)
    fx1 = jax.block_until_ready(fx1)
    hs1 = jax.block_until_ready(hs1)
    fx1_ref, hs1_ref = reference_forward(x_seq[0], hs, params, dt=DT)
    np.testing.assert_allclose(np.asarray(fx1), np.asarray(fx1_ref), rtol=1e-5, atol=1e-5)
    np.testing.assert_allclose(np.asarray(hs1), np.asarray(hs1_ref), rtol=1e-5, atol=1e-5)
    assert fx1.shape == (B, U) and hs1.shape == (B, 4, C0, 1)

    # --- T-step fused recurrence (one pallas_call, hs resident in VMEM) -----
    fxT, hsT = kinetics_one_pixel_forward(x_seq, hs, prep, dt=DT)
    fxT = jax.block_until_ready(fxT)
    hsT = jax.block_until_ready(hsT)

    h_ref = hs
    fx_refs = []
    for t in range(T):
        f_ref, h_ref = reference_forward(x_seq[t], h_ref, params, dt=DT)
        fx_refs.append(f_ref)
    fxT_ref = jnp.stack(fx_refs, axis=0)
    np.testing.assert_allclose(np.asarray(fxT), np.asarray(fxT_ref), rtol=1e-4, atol=1e-5)
    np.testing.assert_allclose(np.asarray(hsT), np.asarray(h_ref), rtol=1e-4, atol=1e-5)
    assert fxT.shape == (T, B, U) and hsT.shape == (B, 4, C0, 1)

    print("KERNEL_OK")
</pallas_src>

<mosaic_0001>
module attributes {stable_mosaic.version = 11 : i64} {
  func.func @_kinetics_one_pixel_kernel(%arg0: i32, %arg1: memref<1x40x4xf32, #tpu.memory_space<vmem>>, %arg2: memref<4x8x4xf32, #tpu.memory_space<vmem>>, %arg3: memref<8x8x1xf32, #tpu.memory_space<vmem>>, %arg4: memref<8x40xf32, #tpu.memory_space<vmem>>, %arg5: memref<8x8xf32, #tpu.memory_space<vmem>>, %arg6: memref<5x8xf32, #tpu.memory_space<vmem>>, %arg7: memref<8x1xf32, #tpu.memory_space<vmem>>, %arg8: memref<1x5x4xf32, #tpu.memory_space<vmem>>, %arg9: memref<4x8x4xf32, #tpu.memory_space<vmem>>) attributes {dimension_semantics = [#tpu.dimension_semantics<arbitrary>], iteration_bounds = array<i64: 1>, scalar_prefetch = 0 : i64, scratch_operands = 0 : i64, tpu.core_type = #tpu.core_type<tc>, window_params = [{transform_indices = @transform_0, window_bounds = array<i64: 1, 40, 4>}, {pipeline_mode = #tpu.pipeline_mode<synchronous>, transform_indices = @transform_1, window_bounds = array<i64: 4, 8, 4>}, {pipeline_mode = #tpu.pipeline_mode<synchronous>, transform_indices = @transform_2, window_bounds = array<i64: 8, 8, 1>}, {pipeline_mode = #tpu.pipeline_mode<synchronous>, transform_indices = @transform_3, window_bounds = array<i64: 8, 40>}, {pipeline_mode = #tpu.pipeline_mode<synchronous>, transform_indices = @transform_4, window_bounds = array<i64: 8, 8>}, {pipeline_mode = #tpu.pipeline_mode<synchronous>, transform_indices = @transform_5, window_bounds = array<i64: 5, 8>}, {pipeline_mode = #tpu.pipeline_mode<synchronous>, transform_indices = @transform_6, window_bounds = array<i64: 8, 1>}, {transform_indices = @transform_7, window_bounds = array<i64: 1, 5, 4>}, {pipeline_mode = #tpu.pipeline_mode<synchronous>, transform_indices = @transform_8, window_bounds = array<i64: 4, 8, 4>}]} {
    %c0_i32 = arith.constant 0 : i32
    %0 = arith.cmpi eq, %arg0, %c0_i32 : i32
    %1 = arith.extui %0 : i1 to i32
    %c0_i32_0 = arith.constant 0 : i32
    %2 = arith.cmpi ne, %1, %c0_i32_0 : i32
    scf.if %2 {
      %c0_68 = arith.constant 0 : index
      %c0_69 = arith.constant 0 : index
      %c0_70 = arith.constant 0 : index
      %114 = vector.load %arg2[%c0_68, %c0_69, %c0_70] : memref<4x8x4xf32, #tpu.memory_space<vmem>>, vector<4x8x4xf32>
      %c0_71 = arith.constant 0 : index
      %c0_72 = arith.constant 0 : index
      %c0_73 = arith.constant 0 : index
      %115 = vector.load %arg9[%c0_71, %c0_72, %c0_73] : memref<4x8x4xf32, #tpu.memory_space<vmem>>, vector<4x8x4xf32>
      tpu.vector_store %arg9[%c0_71, %c0_72, %c0_73], %114 {strides = array<i32>} : memref<4x8x4xf32, #tpu.memory_space<vmem>>, vector<4x8x4xf32>,
    } else {
    }
    %c0 = arith.constant 0 : index
    %c0_1 = arith.constant 0 : index
    %c0_2 = arith.constant 0 : index
    %3 = vector.load %arg1[%c0, %c0_1, %c0_2] : memref<1x40x4xf32, #tpu.memory_space<vmem>>, vector<1x40x4xf32>
    %4 = vector.shape_cast %3 : vector<1x40x4xf32> to vector<40x4xf32>
    %c0_3 = arith.constant 0 : index
    %c0_4 = arith.constant 0 : index
    %5 = vector.load %arg4[%c0_3, %c0_4] : memref<8x40xf32, #tpu.memory_space<vmem>>, vector<8x40xf32>
    %cst = arith.constant dense<0.000000e+00> : vector<8x4xf32>
    %6 = tpu.matmul %5, %4, %cst {dimension_numbers = #tpu.dot_dimension_numbers<[1], [0], [0], [1], [0, 0, 1, 1], [], []>} : vector<8x40xf32>, vector<40x4xf32>, vector<8x4xf32> -> vector<8x4xf32>
    %c0_5 = arith.constant 0 : index
    %c0_6 = arith.constant 0 : index
    %c0_7 = arith.constant 0 : index
    %7 = vector.load %arg3[%c0_5, %c0_6, %c0_7] : memref<8x8x1xf32, #tpu.memory_space<vmem>>, vector<1x8x1xf32>
    %8 = vector.shape_cast %7 : vector<1x8x1xf32> to vector<8x1xf32>
    %9 = vector.broadcast %8 : vector<8x1xf32> to vector<8x4xf32>
    %10 = arith.addf %6, %9 : vector<8x4xf32>
    %cst_8 = arith.constant 0.000000e+00 : f32
    %11 = vector.broadcast %cst_8 : f32 to vector<8x4xf32>
    %12 = arith.subf %11, %10 : vector<8x4xf32>
    %13 = math.exp %12 : vector<8x4xf32>
    %cst_9 = arith.constant 1.000000e+00 : f32
    %14 = vector.broadcast %cst_9 : f32 to vector<8x4xf32>
    %15 = arith.addf %14, %13 : vector<8x4xf32>
    %cst_10 = arith.constant 1.000000e+00 : f32
    %16 = vector.broadcast %cst_10 : f32 to vector<8x4xf32>
    %17 = arith.divf %16, %15 : vector<8x4xf32>
    %c1 = arith.constant 1 : index
    %c0_11 = arith.constant 0 : index
    %c0_12 = arith.constant 0 : index
    %18 = vector.load %arg3[%c1, %c0_11, %c0_12] : memref<8x8x1xf32, #tpu.memory_space<vmem>>, vector<1x8x1xf32>
    %19 = vector.shape_cast %18 : vector<1x8x1xf32> to vector<8x1xf32>
    %c2 = arith.constant 2 : index
    %c0_13 = arith.constant 0 : index
    %c0_14 = arith.constant 0 : index
    %20 = vector.load %arg3[%c2, %c0_13, %c0_14] : memref<8x8x1xf32, #tpu.memory_space<vmem>>, vector<1x8x1xf32>
    %21 = vector.shape_cast %20 : vector<1x8x1xf32> to vector<8x1xf32>
    %c3 = arith.constant 3 : index
    %c0_15 = arith.constant 0 : index
    %c0_16 = arith.constant 0 : index
    %22 = vector.load %arg3[%c3, %c0_15, %c0_16] : memref<8x8x1xf32, #tpu.memory_space<vmem>>, vector<1x8x1xf32>
    %23 = vector.shape_cast %22 : vector<1x8x1xf32> to vector<8x1xf32>
    %c4 = arith.constant 4 : index
    %c0_17 = arith.constant 0 : index
    %c0_18 = arith.constant 0 : index
    %24 = vector.load %arg3[%c4, %c0_17, %c0_18] : memref<8x8x1xf32, #tpu.memory_space<vmem>>, vector<1x8x1xf32>
    %25 = vector.shape_cast %24 : vector<1x8x1xf32> to vector<8x1xf32>
    %c5 = arith.constant 5 : index
    %c0_19 = arith.constant 0 : index
    %c0_20 = arith.constant 0 : index
    %26 = vector.load %arg3[%c5, %c0_19, %c0_20] : memref<8x8x1xf32, #tpu.memory_space<vmem>>, vector<1x8x1xf32>
    %27 = vector.shape_cast %26 : vector<1x8x1xf32> to vector<8x1xf32>
    %c6 = arith.constant 6 : index
    %c0_21 = arith.constant 0 : index
    %c0_22 = arith.constant 0 : index
    %28 = vector.load %arg3[%c6, %c0_21, %c0_22] : memref<8x8x1xf32, #tpu.memory_space<vmem>>, vector<1x8x1xf32>
    %29 = vector.shape_cast %28 : vector<1x8x1xf32> to vector<8x1xf32>
    %c7 = arith.constant 7 : index
    %c0_23 = arith.constant 0 : index
    %c0_24 = arith.constant 0 : index
    %30 = vector.load %arg3[%c7, %c0_23, %c0_24] : memref<8x8x1xf32, #tpu.memory_space<vmem>>, vector<1x8x1xf32>
    %31 = vector.shape_cast %30 : vector<1x8x1xf32> to vector<8x1xf32>
    %c0_25 = arith.constant 0 : index
    %c0_26 = arith.constant 0 : index
    %c0_27 = arith.constant 0 : index
    %32 = vector.load %arg9[%c0_25, %c0_26, %c0_27] : memref<4x8x4xf32, #tpu.memory_space<vmem>>, vector<1x8x4xf32>
    %33 = vector.shape_cast %32 : vector<1x8x4xf32> to vector<8x4xf32>
    %c1_28 = arith.constant 1 : index
    %c0_29 = arith.constant 0 : index
    %c0_30 = arith.constant 0 : index
    %34 = vector.load %arg9[%c1_28, %c0_29, %c0_30] : memref<4x8x4xf32, #tpu.memory_space<vmem>>, vector<1x8x4xf32>
    %35 = vector.shape_cast %34 : vector<1x8x4xf32> to vector<8x4xf32>
    %c2_31 = arith.constant 2 : index
    %c0_32 = arith.constant 0 : index
    %c0_33 = arith.constant 0 : index
    %36 = vector.load %arg9[%c2_31, %c0_32, %c0_33] : memref<4x8x4xf32, #tpu.memory_space<vmem>>, vector<1x8x4xf32>
    %37 = vector.shape_cast %36 : vector<1x8x4xf32> to vector<8x4xf32>
    %c3_34 = arith.constant 3 : index
    %c0_35 = arith.constant 0 : index
    %c0_36 = arith.constant 0 : index
    %38 = vector.load %arg9[%c3_34, %c0_35, %c0_36] : memref<4x8x4xf32, #tpu.memory_space<vmem>>, vector<1x8x4xf32>
    %39 = vector.shape_cast %38 : vector<1x8x4xf32> to vector<8x4xf32>
    %40 = vector.broadcast %19 : vector<8x1xf32> to vector<8x4xf32>
    %41 = arith.mulf %40, %17 : vector<8x4xf32>
    %42 = vector.broadcast %23 : vector<8x1xf32> to vector<8x4xf32>
    %43 = arith.mulf %42, %37 : vector<8x4xf32>
    %44 = arith.mulf %41, %33 : vector<8x4xf32>
    %45 = arith.subf %43, %44 : vector<8x4xf32>
    %cst_37 = arith.constant 0.00999999977 : f32
    %46 = vector.broadcast %cst_37 : f32 to vector<8x4xf32>
    %47 = arith.mulf %46, %45 : vector<8x4xf32>
    %48 = arith.addf %33, %47 : vector<8x4xf32>
    %49 = arith.mulf %41, %33 : vector<8x4xf32>
    %50 = vector.broadcast %21 : vector<8x1xf32> to vector<8x4xf32>
    %51 = arith.mulf %50, %35 : vector<8x4xf32>
    %52 = arith.subf %49, %51 : vector<8x4xf32>
    %cst_38 = arith.constant 0.00999999977 : f32
    %53 = vector.broadcast %cst_38 : f32 to vector<8x4xf32>
    %54 = arith.mulf %53, %52 : vector<8x4xf32>
    %55 = arith.addf %35, %54 : vector<8x4xf32>
    %56 = vector.broadcast %21 : vector<8x1xf32> to vector<8x4xf32>
    %57 = arith.mulf %56, %35 : vector<8x4xf32>
    %58 = vector.broadcast %27 : vector<8x1xf32> to vector<8x4xf32>
    %59 = arith.mulf %58, %39 : vector<8x4xf32>
    %60 = arith.addf %57, %59 : vector<8x4xf32>
    %61 = arith.addf %23, %25 : vector<8x1xf32>
    %62 = vector.broadcast %61 : vector<8x1xf32> to vector<8x4xf32>
    %63 = arith.mulf %62, %37 : vector<8x4xf32>
    %64 = arith.subf %60, %63 : vector<8x4xf32>
    %cst_39 = arith.constant 0.00999999977 : f32
    %65 = vector.broadcast %cst_39 : f32 to vector<8x4xf32>
    %66 = arith.mulf %65, %64 : vector<8x4xf32>
    %67 = arith.addf %37, %66 : vector<8x4xf32>
    %68 = vector.broadcast %25 : vector<8x1xf32> to vector<8x4xf32>
    %69 = arith.mulf %68, %37 : vector<8x4xf32>
    %70 = vector.broadcast %27 : vector<8x1xf32> to vector<8x4xf32>
    %71 = arith.mulf %70, %39 : vector<8x4xf32>
    %72 = arith.subf %69, %71 : vector<8x4xf32>
    %cst_40 = arith.constant 0.00999999977 : f32
    %73 = vector.broadcast %cst_40 : f32 to vector<8x4xf32>
    %74 = arith.mulf %73, %72 : vector<8x4xf32>
    %75 = arith.addf %39, %74 : vector<8x4xf32>
    %c0_41 = arith.constant 0 : index
    %c0_42 = arith.constant 0 : index
    %c0_43 = arith.constant 0 : index
    %76 = vector.load %arg9[%c0_41, %c0_42, %c0_43] : memref<4x8x4xf32, #tpu.memory_space<vmem>>, vector<1x8x4xf32>
    %77 = vector.shape_cast %76 : vector<1x8x4xf32> to vector<8x4xf32>
    %78 = vector.shape_cast %48 : vector<8x4xf32> to vector<1x8x4xf32>
    tpu.vector_store %arg9[%c0_41, %c0_42, %c0_43], %78 {strides = array<i32>} : memref<4x8x4xf32, #tpu.memory_space<vmem>>, vector<1x8x4xf32>,
    %c1_44 = arith.constant 1 : index
    %c0_45 = arith.constant 0 : index
    %c0_46 = arith.constant 0 : index
    %79 = vector.load %arg9[%c1_44, %c0_45, %c0_46] : memref<4x8x4xf32, #tpu.memory_space<vmem>>, vector<1x8x4xf32>
    %80 = vector.shape_cast %79 : vector<1x8x4xf32> to vector<8x4xf32>
    %81 = vector.shape_cast %55 : vector<8x4xf32> to vector<1x8x4xf32>
    tpu.vector_store %arg9[%c1_44, %c0_45, %c0_46], %81 {strides = array<i32>} : memref<4x8x4xf32, #tpu.memory_space<vmem>>, vector<1x8x4xf32>,
    %c2_47 = arith.constant 2 : index
    %c0_48 = arith.constant 0 : index
    %c0_49 = arith.constant 0 : index
    %82 = vector.load %arg9[%c2_47, %c0_48, %c0_49] : memref<4x8x4xf32, #tpu.memory_space<vmem>>, vector<1x8x4xf32>
    %83 = vector.shape_cast %82 : vector<1x8x4xf32> to vector<8x4xf32>
    %84 = vector.shape_cast %67 : vector<8x4xf32> to vector<1x8x4xf32>
    tpu.vector_store %arg9[%c2_47, %c0_48, %c0_49], %84 {strides = array<i32>} : memref<4x8x4xf32, #tpu.memory_space<vmem>>, vector<1x8x4xf32>,
    %c3_50 = arith.constant 3 : index
    %c0_51 = arith.constant 0 : index
    %c0_52 = arith.constant 0 : index
    %85 = vector.load %arg9[%c3_50, %c0_51, %c0_52] : memref<4x8x4xf32, #tpu.memory_space<vmem>>, vector<1x8x4xf32>
    %86 = vector.shape_cast %85 : vector<1x8x4xf32> to vector<8x4xf32>
    %87 = vector.shape_cast %75 : vector<8x4xf32> to vector<1x8x4xf32>
    tpu.vector_store %arg9[%c3_50, %c0_51, %c0_52], %87 {strides = array<i32>} : memref<4x8x4xf32, #tpu.memory_space<vmem>>, vector<1x8x4xf32>,
    %88 = vector.broadcast %29 : vector<8x1xf32> to vector<8x4xf32>
    %89 = arith.mulf %88, %55 : vector<8x4xf32>
    %90 = vector.broadcast %31 : vector<8x1xf32> to vector<8x4xf32>
    %91 = arith.addf %89, %90 : vector<8x4xf32>
    %cst_53 = arith.constant 0.000000e+00 : f32
    %92 = vector.broadcast %cst_53 : f32 to vector<8x4xf32>
    %93 = arith.maximumf %91, %92 : vector<8x4xf32>
    %c0_54 = arith.constant 0 : index
    %c0_55 = arith.constant 0 : index
    %94 = vector.load %arg5[%c0_54, %c0_55] : memref<8x8xf32, #tpu.memory_space<vmem>>, vector<8x8xf32>
    %cst_56 = arith.constant dense<0.000000e+00> : vector<8x4xf32>
    %95 = tpu.matmul %94, %93, %cst_56 {dimension_numbers = #tpu.dot_dimension_numbers<[1], [0], [0], [1], [0, 0, 1, 1], [], []>} : vector<8x8xf32>, vector<8x4xf32>, vector<8x4xf32> -> vector<8x4xf32>
    %c0_57 = arith.constant 0 : index
    %c0_58 = arith.constant 0 : index
    %96 = vector.load %arg7[%c0_57, %c0_58] : memref<8x1xf32, #tpu.memory_space<vmem>>, vector<8x1xf32>
    %97 = vector.broadcast %96 : vector<8x1xf32> to vector<8x4xf32>
    %98 = arith.addf %95, %97 : vector<8x4xf32>
    %cst_59 = arith.constant 0.000000e+00 : f32
    %99 = vector.broadcast %cst_59 : f32 to vector<8x4xf32>
    %100 = arith.maximumf %98, %99 : vector<8x4xf32>
    %c0_60 = arith.constant 0 : index
    %c0_61 = arith.constant 0 : index
    %101 = vector.load %arg6[%c0_60, %c0_61] : memref<5x8xf32, #tpu.memory_space<vmem>>, vector<5x8xf32>
    %cst_62 = arith.constant dense<0.000000e+00> : vector<5x4xf32>
    %102 = tpu.matmul %101, %100, %cst_62 {dimension_numbers = #tpu.dot_dimension_numbers<[1], [0], [0], [1], [0, 0, 1, 1], [], []>} : vector<5x8xf32>, vector<8x4xf32>, vector<5x4xf32> -> vector<5x4xf32>
    %cst_63 = arith.constant 0.000000e+00 : f32
    %103 = vector.broadcast %cst_63 : f32 to vector<5x4xf32>
    %104 = arith.maximumf %102, %103 : vector<5x4xf32>
    %105 = math.absf %102 : vector<5x4xf32>
    %cst_64 = arith.constant 0.000000e+00 : f32
    %106 = vector.broadcast %cst_64 : f32 to vector<5x4xf32>
    %107 = arith.subf %106, %105 : vector<5x4xf32>
    %108 = math.exp %107 : vector<5x4xf32>
    %109 = math.log1p %108 : vector<5x4xf32>
    %110 = arith.addf %104, %109 : vector<5x4xf32>
    %c0_65 = arith.constant 0 : index
    %c0_66 = arith.constant 0 : index
    %c0_67 = arith.constant 0 : index
    %111 = vector.load %arg8[%c0_65, %c0_66, %c0_67] : memref<1x5x4xf32, #tpu.memory_space<vmem>>, vector<1x5x4xf32>
    %112 = vector.shape_cast %111 : vector<1x5x4xf32> to vector<5x4xf32>
    %113 = vector.shape_cast %110 : vector<5x4xf32> to vector<1x5x4xf32>
    tpu.vector_store %arg8[%c0_65, %c0_66, %c0_67], %113 {strides = array<i32>} : memref<1x5x4xf32, #tpu.memory_space<vmem>>, vector<1x5x4xf32>,
    return
  }
  func.func @transform_0(%arg0: i32) -> (i32, i32, i32) {
    %c0_i32 = arith.constant 0 : i32
    %c0_i32_0 = arith.constant 0 : i32
    %c0_i32_1 = arith.constant 0 : i32
    return %arg0, %c0_i32, %c0_i32_0 : i32, i32, i32
  }
  func.func @transform_1(%arg0: i32) -> (i32, i32, i32) {
    %c0_i32 = arith.constant 0 : i32
    %c0_i32_0 = arith.constant 0 : i32
    %c0_i32_1 = arith.constant 0 : i32
    %c0_i32_2 = arith.constant 0 : i32
    return %c0_i32, %c0_i32_0, %c0_i32_1 : i32, i32, i32
  }
  func.func @transform_2(%arg0: i32) -> (i32, i32, i32) {
    %c0_i32 = arith.constant 0 : i32
    %c0_i32_0 = arith.constant 0 : i32
    %c0_i32_1 = arith.constant 0 : i32
    %c0_i32_2 = arith.constant 0 : i32
    return %c0_i32, %c0_i32_0, %c0_i32_1 : i32, i32, i32
  }
  func.func @transform_3(%arg0: i32) -> (i32, i32) {
    %c0_i32 = arith.constant 0 : i32
    %c0_i32_0 = arith.constant 0 : i32
    %c0_i32_1 = arith.constant 0 : i32
    return %c0_i32, %c0_i32_0 : i32, i32
  }
  func.func @transform_4(%arg0: i32) -> (i32, i32) {
    %c0_i32 = arith.constant 0 : i32
    %c0_i32_0 = arith.constant 0 : i32
    %c0_i32_1 = arith.constant 0 : i32
    return %c0_i32, %c0_i32_0 : i32, i32
  }
  func.func @transform_5(%arg0: i32) -> (i32, i32) {
    %c0_i32 = arith.constant 0 : i32
    %c0_i32_0 = arith.constant 0 : i32
    %c0_i32_1 = arith.constant 0 : i32
    return %c0_i32, %c0_i32_0 : i32, i32
  }
  func.func @transform_6(%arg0: i32) -> (i32, i32) {
    %c0_i32 = arith.constant 0 : i32
    %c0_i32_0 = arith.constant 0 : i32
    %c0_i32_1 = arith.constant 0 : i32
    return %c0_i32, %c0_i32_0 : i32, i32
  }
  func.func @transform_7(%arg0: i32) -> (i32, i32, i32) {
    %c0_i32 = arith.constant 0 : i32
    %c0_i32_0 = arith.constant 0 : i32
    %c0_i32_1 = arith.constant 0 : i32
    return %arg0, %c0_i32, %c0_i32_0 : i32, i32, i32
  }
  func.func @transform_8(%arg0: i32) -> (i32, i32, i32) {
    %c0_i32 = arith.constant 0 : i32
    %c0_i32_0 = arith.constant 0 : i32
    %c0_i32_1 = arith.constant 0 : i32
    %c0_i32_2 = arith.constant 0 : i32
    return %c0_i32, %c0_i32_0, %c0_i32_1 : i32, i32, i32
  }
}

</mosaic_0001>

<bundles_post_ra>
// kernel: kinetics_one_pixel_forward.1
= control target key start
LH: loop header
LB: loop body
LE: loop exit
PB: predicated region body
PF: predicated region fallthrough
CT: control target
= control target key end

     0   :  { %v295_v0 = vmov 0   ;;  %vm53_vm0 = vcmask 326656   ;;  %vm36_vm1 = vcmask 31744   ;;  %vm193_vm6 = vcmask 64512   ;;  %s457_s2 = inlined_call_operand.vmem [shape: f32[8,8,1], index: 2, kind: input, shape index: {}]   ;;  %s458_s0 = inlined_call_operand.vmem [shape: f32[1,40,4], index: 0, kind: input, shape index: {}]   ;;  %s459_s3 = inlined_call_operand.vmem [shape: f32[8,40], index: 3, kind: input, shape index: {}]   ;;  %s460_s6 = inlined_call_operand.vmem [shape: f32[8,1], index: 6, kind: input, shape index: {}]   ;;  %s461_s1 = inlined_call_operand.vmem [shape: f32[4,8,4], index: 1, kind: input, shape index: {}, may-alias: {1,8}]   ;;  %s462_s8 = inlined_call_operand.vmem [shape: f32[4,8,4], index: 8, kind: output, shape index: {1}, may-alias: {1,8}]   ;;  %s463_s4 = inlined_call_operand.vmem [shape: f32[8,8], index: 4, kind: input, shape index: {}]   ;;  %s464_s5 = inlined_call_operand.vmem [shape: f32[5,8], index: 5, kind: input, shape index: {}]   ;;  %s465_s7 = inlined_call_operand.vmem [shape: f32[1,5,4], index: 7, kind: output, shape index: {0}]  }
   0x1   :  { %284 = vset.pattern.permute.xlu0 %v295_v0  ;;  %v47_v1 = vld [vmem:[%s457_s2] sm:$0xff]  ;;  %v44_v3 = vld [vmem:[%s458_s0 + $0x18] sm:$0xff]  ;;  %285 = vset.pattern.permute.xlu1 %v295_v0  ;;  %v43_v4 = vld [vmem:[%s458_s0 + $0x10] sm:$0xff]  ;;  %vm257_vm8 = vcmask 28672  }
   0x2   :  { %v45_v2 = vld [vmem:[%s458_s0 + $0x20] sm:$0xff]  ;;  %50 = vperm.xlu0 %284, %v47_v1   ;;  %286 = vset.pattern.permute.xlu2 %v295_v0  ;;  %v269_v5 = vld [vmem:[%s457_s2 + $0x10] sm:$0xff]  ;;  %v42_v6 = vld [vmem:[%s458_s0 + $0x8] sm:$0xff] }
   0x3   :  { %68 = vmatpush.msra.mxu0 %v45_v2  ;;  %135 = vperm.xlu1 %285, %v269_v5   ;;  %v274_v7 = vld [vmem:[%s457_s2 + $0x38] sm:$0xff]  ;;  %v268_v8 = vld [vmem:[%s457_s2 + $0x8] sm:$0xff]  ;;  %v41_v9 = vld [vmem:[%s458_s0] sm:$0xff] }
   0x4   :  { %181 = vperm.xlu2 %286, %v274_v7   ;;  %v46_v10 = vld [vmem:[%s459_s3] sm:$0xff]  ;;  %v273_v11 = vld [vmem:[%s457_s2 + $0x30] sm:$0xff]  ;;  %v272_v13 = vld [vmem:[%s457_s2 + $0x28] sm:$0xff] }
   0x5   :  { %69 = vmatpush.msra.mxu0 %v44_v3  ;;  %v187_v12 = vld [vmem:[%s460_s6] sm:$0xff]  ;;  %v270_v14 = vld [vmem:[%s457_s2 + $0x18] sm:$0xff]  ;;  %v33_v18 = vld [vmem:[%s461_s1 + $0x8] sm:$0xff] }
   0x6   :  { %v271_v15 = vld [vmem:[%s457_s2 + $0x20] sm:$0xff]  ;;  %v35_v17 = vld [vmem:[%s461_s1 + $0x18] sm:$0xff] }
   0x7   :  { %70 = vmatpush.msra.mxu0 %v43_v4  ;;  %v149_v16 = vadd.f32 %v271_v15, %v270_v14  ;;  %40 = vst.msk [vmem:[%s462_s8 + $0x18] sm:$0xff] %vm36_vm1, %v35_v17 }
   0x8   :  { %38 = vst.msk [vmem:[%s462_s8 + $0x8] sm:$0xff] %vm36_vm1, %v33_v18 }
   0x9   :  { %71 = vmatpush.msra.mxu0 %v42_v6 }
   0xa   :  { %119 = vperm.xlu0 %284, %v268_v8  }
   0xb   :  { %72 = vmatpush.msra.mxu0 %v41_v9  ;;  %175 = vperm.xlu1 %285, %v273_v11  }
   0xc   :  { %267 = vmatmul.msk.f32.vlgmr.msra.gmra.mxu0 %vm53_vm0, %v46_v10  ;;  %190 = vperm.xlu2 %286, %v187_v12   ;;  %v186_v10 = vld [vmem:[%s463_s4] sm:$0xff] }
   0xe   :  { %v277_v27 = vld [vmem:[%s462_s8 + $0x18] sm:$0xff] }
   0xf   :  { %v34_v19 = vld [vmem:[%s461_s1 + $0x10] sm:$0xff]  ;;  %v275_v25 = vld [vmem:[%s462_s8 + $0x8] sm:$0xff] }
  0x10   :  { %39 = vst.msk [vmem:[%s462_s8 + $0x10] sm:$0xff] %vm36_vm1, %v34_v19 }
  0x12   :  { %144 = vperm.xlu0 %284, %v272_v13  }
  0x13   :  { %125 = vperm.xlu1 %285, %v270_v14   ;;  %v218_v14 = vld [vmem:[%s464_s5] sm:$0x1f] }
  0x14   :  { %152 = vperm.xlu2 %286, %v149_v16  }
  0x17   :  { %v32_v26 = vld [vmem:[%s461_s1] sm:$0xff]  ;;  %v276_v29 = vld [vmem:[%s462_s8 + $0x10] sm:$0xff] }
  0x18   :  { %37 = vst.msk [vmem:[%s462_s8] sm:$0xff] %vm36_vm1, %v32_v26 }
  0x1a   :  { %161 = vperm.xlu0 %284, %v271_v15  }
  0x1f   :  { %v110_v61 = vld [vmem:[%s462_s8] sm:$0xff] }
  0x5e   :  { %v407_v20 = vpop.permute.xlu2 %181 }
  0x66   :  { %v409_v22 = vpop.permute.xlu2 %190 }
  0x6e   :  { %v153_v28 = vpop.permute.xlu2 %152 }
  0x6f   :  { %v155_v33 = vmul.f32 %v276_v29, %v153_v28 }
  0x74   :  { %v51_v21 = vpop.permute.xlu0 %50 }
  0x75   :  { %v136_v24 = vpop.permute.xlu1 %135 }
  0x76   :  { %v138_v30 = vmul.f32 %v275_v25, %v136_v24 }
  0x7c   :  { %v120_v23 = vpop.permute.xlu0 %119 }
  0x7d   :  { %v176_v49 = vpop.permute.xlu1 %175 }
  0x84   :  { %v145_v31 = vpop.permute.xlu0 %144 }
  0x85   :  { %v147_v32 = vmul.f32 %v277_v27, %v145_v31  ;;  %v126_v58 = vpop.permute.xlu1 %125 }
  0x86   :  { %v128_v63 = vmul.f32 %v276_v29, %v126_v58 }
  0x87   :  { %v148_v34 = vadd.f32 %v147_v32, %v138_v30 }
  0x89   :  { %v74_v35 = vpop.f32.mrf.mxu0  ;;  %v156_v37 = vsub.f32 %v148_v34, %v155_v33 }
  0x8a   :  { %v75_v36 = vadd.f32 %v74_v35, %v51_v21 }
  0x8b   :  { %v157_v39 = vmul.f32 0.01, %v156_v37 }
  0x8c   :  { %v77_v38 = vsub.f32 0.0, %v75_v36  ;;  %v162_v40 = vpop.permute.xlu0 %161 }
  0x8d   :  { %v158_v42 = vadd.f32 %v276_v29, %v157_v39  ;;  %v164_v43 = vmul.f32 %v276_v29, %v162_v40 }
  0x8e   :  { %v78_v41 = vmul.f32 1.442695, %v77_v38 }
  0x8f   :  { %279 = vst.msk [vmem:[%s462_s8 + $0x10] sm:$0xff] %vm36_vm1, %v158_v42  ;;  %v165_v44 = vsub.f32 %v164_v43, %v147_v32 }
  0x90   :  { %287 = vpow2.f32 %v78_v41 }
  0x91   :  { %v166_v45 = vmul.f32 0.01, %v165_v44 }
  0x93   :  { %v167_v46 = vadd.f32 %v277_v27, %v166_v45 }
  0x95   :  { %280 = vst.msk [vmem:[%s462_s8 + $0x18] sm:$0xff] %vm36_vm1, %v167_v46 }
  0x96   :  { %v288_v47 = vpop.eup %287 }
  0x97   :  { %v80_v48 = vadd.f32 1.0, %v288_v47 }
  0x99   :  { %289 = vrcp.f32 %v80_v48  ;;  %v92_v53 = vand.u32 2147483648, %v80_v48  ;;  %v90_v55 = vand.u32 2147483647, %v80_v48  ;;  %vm86_vm3 = vweird.f32 %v80_v48 }
  0x9b   :  { %v93_v57 = vor.u32 1.1754944e-38, %v92_v53  ;;  %vm91_vm5 = vcmp.eq.f32.partialorder %v90_v55, 8.507059e+37 }
  0x9f   :  { %v290_v50 = vpop.eup %289 }
  0xa0   :  { %v82_v51 = vmul.f32 %v290_v50, %v80_v48  ;;  %vm87_vm2 = vweird.f32 %v290_v50 }
  0xa1   :  { %vm88_vm4 = vmor %vm86_vm3, %vm87_vm2 }
  0xa2   :  { %v83_v52 = vsub.f32 1.0, %v82_v51 }
  0xa4   :  { %v84_v54 = vmul.f32 %v290_v50, %v83_v52 }
  0xa6   :  { %v85_v56 = vadd.f32 %v290_v50, %v84_v54 }
  0xa8   :  { %v89_v59 = vsel %vm88_vm4, %v290_v50, %v85_v56 }
  0xa9   :  { %v94_v60 = vsel %vm91_vm5, %v93_v57, %v89_v59 }
  0xaa   :  { %v122_v62 = vmul.f32 %v120_v23, %v94_v60 }
  0xac   :  { %v129_v0 = vmul.f32 %v122_v62, %v110_v61 }
  0xae   :  { %v139_v1 = vsub.f32 %v129_v0, %v138_v30  ;;  %v130_v2 = vsub.f32 %v128_v63, %v129_v0 }
  0xb0   :  { %v140_v3 = vmul.f32 0.01, %v139_v1  ;;  %v131_v4 = vmul.f32 0.01, %v130_v2 }
  0xb2   :  { %v141_v5 = vadd.f32 %v275_v25, %v140_v3  ;;  %v132_v6 = vadd.f32 %v131_v4, %v110_v61 }
  0xb4   :  { %278 = vst.msk [vmem:[%s462_s8 + $0x8] sm:$0xff] %vm36_vm1, %v141_v5  ;;  %v178_v7 = vmul.f32 %v176_v49, %v141_v5 }
  0xb5   :  { %169 = vst.msk [vmem:[%s462_s8] sm:$0xff] %vm36_vm1, %v132_v6 }
  0xb6   :  { %v184_v8 = vadd.f32 %v407_v20, %v178_v7 }
  0xb8   :  { %v185_v9 = vmax.f32 %v184_v8, 0.0 }
  0xba   :  { %212 = vmatpush.msra.mxu1 %v185_v9 }
  0xbb   :  { %281 = vmatmul.msk.f32.vlgmr.msra.gmra.mxu1 %vm193_vm6, %v186_v10 }
 0x138   :  { %v214_v11 = vpop.f32.mrf.mxu1 }
 0x139   :  { %v215_v12 = vadd.f32 %v214_v11, %v409_v22 }
 0x13b   :  { %v217_v13 = vmax.f32 %v215_v12, 0.0 }
 0x13d   :  { %237 = vmatpush.msra.mxu2 %v217_v13 }
 0x13e   :  { %282 = vmatmul.msk.f32.vlgmr.msra.gmra.mxu2 %vm193_vm6, %v218_v14 }
 0x1c1   :  { %v239_v15 = vpop.f32.mrf.mxu2 }
 0x1c2   :  { %v243_v16 = vand.u32 2147483647, %v239_v15  ;;  %v242_v27 = vmax.f32 %v239_v15, 0.0 }
 0x1c4   :  { %v244_v17 = vsub.f32 0.0, %v243_v16 }
 0x1c6   :  { %v245_v18 = vmul.f32 1.442695, %v244_v17 }
 0x1c8   :  { %291 = vpow2.f32 %v245_v18 }
 0x1ce   :  { %v292_v19 = vpop.eup %291 }
 0x1cf   :  { %v247_v20 = vadd.f32 1.0, %v292_v19  ;;  %v250_v21 = vmul.f32 -0.5, %v292_v19  ;;  %v253_v24 = vand.u32 2147483647, %v292_v19 }
 0x1d1   :  { %293 = vlog2.f32 %v247_v20  ;;  %v251_v23 = vadd.f32 1.0, %v250_v21  ;;  %vm254_vm7 = vcmp.lt.f32.partialorder %v253_v24, 0.0004427343 }
 0x1d3   :  { %v252_v26 = vmul.f32 %v292_v19, %v251_v23 }
 0x1d7   :  { %v294_v25 = vpop.eup %293 }
 0x1d8   :  { %v249_v22 = vmul.f32 0.6931472, %v294_v25 }
 0x1da   :  { %v255_v28 = vsel %vm254_vm7, %v252_v26, %v249_v22 }
 0x1db   :  { %v256_v29 = vadd.f32 %v255_v28, %v242_v27 }
 0x1dd   :  { %258 = vst.msk [vmem:[%s465_s7] sm:$0x1f] %vm257_vm8, %v256_v29 }

</bundles_post_ra>
